<compile_context>
chip_gen: v6e
topology: v6e:2x2x1
jax: 0.10.0
libtpu: 0.0.40
codegen_flags: <defaults>
</compile_context>

<pallas_src>
import functools

import jax
import jax.numpy as jnp
from jax import lax
from jax.experimental import pallas as pl
from jax.experimental.pallas import tpu as pltpu


def _lstm_chunk_kernel(gx_ref, whh_ref, out_ref, hN_ref, cN_ref,
                       h_sc, c_sc, *, hidden_size, t_blk, seq_len, needs_mask):
    """Runs t_blk LSTM timesteps of one layer.

    gx_ref already holds x_t @ W_ih^T + (b_ih + b_hh) for every timestep of the
    chunk, so the per-step work is only gates = gx[t] + h @ W_hh^T plus the
    elementwise gate math.  PyTorch gate order (i, f, g, o).
    """
    chunk = pl.program_id(0)
    H = hidden_size

    @pl.when(chunk == 0)
    def _():
        h_sc[...] = jnp.zeros_like(h_sc)
        c_sc[...] = jnp.zeros_like(c_sc)

    def step(tt, carry):
        h, c = carry
        # Recurrent projection on the MXU: bf16 operands, f32 accumulation.
        gates = gx_ref[tt] + jnp.dot(
            h.astype(whh_ref.dtype), whh_ref[...],
            preferred_element_type=jnp.float32)

        i_g = jax.nn.sigmoid(gates[:, 0 * H:1 * H])
        f_g = jax.nn.sigmoid(gates[:, 1 * H:2 * H])
        g_g = jnp.tanh(gates[:, 2 * H:3 * H])
        o_g = jax.nn.sigmoid(gates[:, 3 * H:4 * H])

        c_new = f_g * c + i_g * g_g
        h_new = o_g * jnp.tanh(c_new)

        if needs_mask:  # only traced when the sequence was padded in time
            valid = (chunk * t_blk + tt) < seq_len
            h_new = jnp.where(valid, h_new, h)
            c_new = jnp.where(valid, c_new, c)

        out_ref[tt] = h_new.astype(out_ref.dtype)
        return h_new, c_new

    h, c = lax.fori_loop(0, t_blk, step, (h_sc[...], c_sc[...]), unroll=True)
    h_sc[...] = h
    c_sc[...] = c

    @pl.when(chunk == pl.num_programs(0) - 1)
    def _():
        hN_ref[...] = h.astype(hN_ref.dtype)
        cN_ref[...] = c.astype(cN_ref.dtype)


def lstm_layer(x, w_ih, w_hh, b_ih, b_hh, *, t_blk=32):
    """One LSTM layer.

    x: (S, B, E) float32.  w_ih: (4H, E), w_hh: (4H, H), biases: (4H,).
    Returns (outputs (S, B, H), h_N (B, H), c_N (B, H)).
    """
    S, B, E = x.shape
    H = w_hh.shape[1]

    # ---- hoisted input projection: one big (S*B, E) x (E, 4H) matmul ----
    gx = jnp.dot(x.reshape(S * B, E), jnp.transpose(w_ih),
                 preferred_element_type=jnp.float32)
    gx = (gx + (b_ih + b_hh)[None, :]).reshape(S, B, 4 * H).astype(jnp.float32)

    # ---- pad batch to the f32 sublane tile, time to a chunk multiple ----
    B_pad = max(8, ((B + 7) // 8) * 8)
    T_BLK = min(t_blk, S)
    n_chunks = (S + T_BLK - 1) // T_BLK
    S_pad = n_chunks * T_BLK
    if (S_pad, B_pad) != (S, B):
        gx = jnp.pad(gx, ((0, S_pad - S), (0, B_pad - B), (0, 0)))

    # Recurrent weight, resident in VMEM, bf16 for the MXU.
    whh_t = jnp.transpose(w_hh).astype(jnp.bfloat16)            # (H, 4H)

    kernel = functools.partial(
        _lstm_chunk_kernel, hidden_size=H, t_blk=T_BLK,
        seq_len=S, needs_mask=(S_pad != S))

    out_shapes = (
        jax.ShapeDtypeStruct((S_pad, B_pad, H), jnp.float32),   # per-step outputs
        jax.ShapeDtypeStruct((B_pad, H), jnp.float32),          # final hidden
        jax.ShapeDtypeStruct((B_pad, H), jnp.float32),          # final cell
    )

    grid_spec = pltpu.PrefetchScalarGridSpec(
        num_scalar_prefetch=0,
        grid=(n_chunks,),
        in_specs=[
            pl.BlockSpec((T_BLK, B_pad, 4 * H), lambda c: (c, 0, 0)),  # gx chunk
            pl.BlockSpec((H, 4 * H), lambda c: (0, 0)),                # W_hh^T (resident)
        ],
        out_specs=[
            pl.BlockSpec((T_BLK, B_pad, H), lambda c: (c, 0, 0)),      # outputs chunk
            pl.BlockSpec((B_pad, H), lambda c: (0, 0)),                # h_N
            pl.BlockSpec((B_pad, H), lambda c: (0, 0)),                # c_N
        ],
        scratch_shapes=[
            pltpu.VMEM((B_pad, H), jnp.float32),    # h carry across chunks
            pltpu.VMEM((B_pad, H), jnp.float32),    # c carry across chunks
        ],
    )

    out, h_n, c_n = pl.pallas_call(
        kernel,
        out_shape=out_shapes,
        grid_spec=grid_spec,
        compiler_params=pltpu.CompilerParams(
            dimension_semantics=("arbitrary",)),    # time recurrence is serial
    )(gx, whh_t)

    return out[:S, :B], h_n[:B], c_n[:B]


def init_params(key, vocab_size, embed_dim, hidden_size, num_layers):
    """Deterministic parameter init mirroring nn.Embedding / nn.LSTM shapes."""
    keys = jax.random.split(key, 1 + 4 * num_layers)
    params = {"embedding": jax.random.normal(keys[0], (vocab_size, embed_dim),
                                             dtype=jnp.float32)}
    bound = 1.0 / jnp.sqrt(hidden_size)
    layers = []
    for l in range(num_layers):
        in_dim = embed_dim if l == 0 else hidden_size
        k = keys[1 + 4 * l: 1 + 4 * (l + 1)]
        layers.append({
            "w_ih": jax.random.uniform(k[0], (4 * hidden_size, in_dim),
                                       minval=-bound, maxval=bound, dtype=jnp.float32),
            "w_hh": jax.random.uniform(k[1], (4 * hidden_size, hidden_size),
                                       minval=-bound, maxval=bound, dtype=jnp.float32),
            "b_ih": jax.random.uniform(k[2], (4 * hidden_size,),
                                       minval=-bound, maxval=bound, dtype=jnp.float32),
            "b_hh": jax.random.uniform(k[3], (4 * hidden_size,),
                                       minval=-bound, maxval=bound, dtype=jnp.float32),
        })
    params["layers"] = layers
    return params


@jax.jit
def rnn_encoder_forward(src, params):
    """src: (S, B) int32 token ids.
    Returns (outputs (S,B,H), (hidden (L,B,H), cell (L,B,H)))."""
    # Embedding lookup + (eval-mode) dropout: glue, done in plain JAX.
    x = jnp.take(params["embedding"], src, axis=0)          # (S, B, E)

    hs, cs = [], []
    for layer in params["layers"]:
        x, h_n, c_n = lstm_layer(x, layer["w_ih"], layer["w_hh"],
                                 layer["b_ih"], layer["b_hh"])
        hs.append(h_n)
        cs.append(c_n)
    hidden = jnp.stack(hs, axis=0)
    cell = jnp.stack(cs, axis=0)
    return x, (hidden, cell)


if __name__ == "__main__":
    VOCAB = 50
    EMBED = 16
    HIDDEN = 32
    LAYERS = 2
    SEQ = 8
    BATCH = 2

    key = jax.random.PRNGKey(0)
    pkey, skey = jax.random.split(key)
    params = init_params(pkey, VOCAB, EMBED, HIDDEN, LAYERS)
    src = jax.random.randint(skey, (SEQ, BATCH), 0, VOCAB, dtype=jnp.int32)

    outputs, (hidden, cell) = rnn_encoder_forward(src, params)
    jax.block_until_ready((outputs, hidden, cell))

    assert outputs.shape == (SEQ, BATCH, HIDDEN)
    assert hidden.shape == (LAYERS, BATCH, HIDDEN)
    assert cell.shape == (LAYERS, BATCH, HIDDEN)
    assert bool(jnp.all(jnp.isfinite(outputs)))
    print("KERNEL_OK")
</pallas_src>

<mosaic_0001>
module attributes {stable_mosaic.version = 11 : i64} {
  func.func @_lstm_chunk_kernel(%arg0: i32, %arg1: memref<8x8x128xf32, #tpu.memory_space<vmem>>, %arg2: memref<32x128xbf16, #tpu.memory_space<vmem>>, %arg3: memref<8x8x32xf32, #tpu.memory_space<vmem>>, %arg4: memref<8x32xf32, #tpu.memory_space<vmem>>, %arg5: memref<8x32xf32, #tpu.memory_space<vmem>>, %arg6: memref<8x32xf32, #tpu.memory_space<vmem>>, %arg7: memref<8x32xf32, #tpu.memory_space<vmem>>) attributes {dimension_semantics = [#tpu.dimension_semantics<arbitrary>], iteration_bounds = array<i64: 1>, scalar_prefetch = 0 : i64, scratch_operands = 2 : i64, tpu.core_type = #tpu.core_type<tc>, window_params = [{transform_indices = @transform_0, window_bounds = array<i64: 8, 8, 128>}, {pipeline_mode = #tpu.pipeline_mode<synchronous>, transform_indices = @transform_1, window_bounds = array<i64: 32, 128>}, {transform_indices = @transform_2, window_bounds = array<i64: 8, 8, 32>}, {pipeline_mode = #tpu.pipeline_mode<synchronous>, transform_indices = @transform_3, window_bounds = array<i64: 8, 32>}, {pipeline_mode = #tpu.pipeline_mode<synchronous>, transform_indices = @transform_4, window_bounds = array<i64: 8, 32>}]} {
    %c0_i32 = arith.constant 0 : i32
    %0 = arith.cmpi eq, %arg0, %c0_i32 : i32
    %1 = arith.extui %0 : i1 to i32
    %c0_i32_0 = arith.constant 0 : i32
    %2 = arith.cmpi ne, %1, %c0_i32_0 : i32
    scf.if %2 {
      %cst_90 = arith.constant 0.000000e+00 : f32
      %298 = vector.broadcast %cst_90 : f32 to vector<8x32xf32>
      %c0_91 = arith.constant 0 : index
      %c0_92 = arith.constant 0 : index
      %299 = vector.load %arg6[%c0_91, %c0_92] : memref<8x32xf32, #tpu.memory_space<vmem>>, vector<8x32xf32>
      tpu.vector_store %arg6[%c0_91, %c0_92], %298 {strides = array<i32>} : memref<8x32xf32, #tpu.memory_space<vmem>>, vector<8x32xf32>,
      %cst_93 = arith.constant 0.000000e+00 : f32
      %300 = vector.broadcast %cst_93 : f32 to vector<8x32xf32>
      %c0_94 = arith.constant 0 : index
      %c0_95 = arith.constant 0 : index
      %301 = vector.load %arg7[%c0_94, %c0_95] : memref<8x32xf32, #tpu.memory_space<vmem>>, vector<8x32xf32>
      tpu.vector_store %arg7[%c0_94, %c0_95], %300 {strides = array<i32>} : memref<8x32xf32, #tpu.memory_space<vmem>>, vector<8x32xf32>,
    } else {
    }
    %c0 = arith.constant 0 : index
    %c0_1 = arith.constant 0 : index
    %3 = vector.load %arg6[%c0, %c0_1] : memref<8x32xf32, #tpu.memory_space<vmem>>, vector<8x32xf32>
    %c0_2 = arith.constant 0 : index
    %c0_3 = arith.constant 0 : index
    %4 = vector.load %arg7[%c0_2, %c0_3] : memref<8x32xf32, #tpu.memory_space<vmem>>, vector<8x32xf32>
    %c0_i32_4 = arith.constant 0 : i32
    %5 = arith.index_cast %c0_i32_4 : i32 to index
    %c0_5 = arith.constant 0 : index
    %c0_6 = arith.constant 0 : index
    %6 = vector.load %arg1[%5, %c0_5, %c0_6] : memref<8x8x128xf32, #tpu.memory_space<vmem>>, vector<1x8x128xf32>
    %7 = vector.shape_cast %6 : vector<1x8x128xf32> to vector<8x128xf32>
    %8 = arith.truncf %3 : vector<8x32xf32> to vector<8x32xbf16>
    %c0_7 = arith.constant 0 : index
    %c0_8 = arith.constant 0 : index
    %9 = vector.load %arg2[%c0_7, %c0_8] : memref<32x128xbf16, #tpu.memory_space<vmem>>, vector<32x128xbf16>
    %cst = arith.constant dense<0.000000e+00> : vector<8x128xf32>
    %10 = tpu.matmul %8, %9, %cst {dimension_numbers = #tpu.dot_dimension_numbers<[1], [0], [0], [1], [0, 0, 1, 1], [], []>} : vector<8x32xbf16>, vector<32x128xbf16>, vector<8x128xf32> -> vector<8x128xf32>
    %11 = arith.addf %7, %10 : vector<8x128xf32>
    %12 = vector.extract_strided_slice %11 {offsets = [0, 0], sizes = [8, 32], strides = [1, 1]} : vector<8x128xf32> to vector<8x32xf32>
    %13 = arith.negf %12 : vector<8x32xf32>
    %14 = math.exp %13 : vector<8x32xf32>
    %cst_9 = arith.constant 1.000000e+00 : f32
    %15 = vector.broadcast %cst_9 : f32 to vector<8x32xf32>
    %16 = arith.addf %15, %14 : vector<8x32xf32>
    %17 = arith.divf %15, %16 : vector<8x32xf32>
    %18 = vector.extract_strided_slice %11 {offsets = [0, 32], sizes = [8, 32], strides = [1, 1]} : vector<8x128xf32> to vector<8x32xf32>
    %19 = arith.negf %18 : vector<8x32xf32>
    %20 = math.exp %19 : vector<8x32xf32>
    %cst_10 = arith.constant 1.000000e+00 : f32
    %21 = vector.broadcast %cst_10 : f32 to vector<8x32xf32>
    %22 = arith.addf %21, %20 : vector<8x32xf32>
    %23 = arith.divf %21, %22 : vector<8x32xf32>
    %24 = vector.extract_strided_slice %11 {offsets = [0, 64], sizes = [8, 32], strides = [1, 1]} : vector<8x128xf32> to vector<8x32xf32>
    %25 = math.tanh %24 : vector<8x32xf32>
    %26 = vector.extract_strided_slice %11 {offsets = [0, 96], sizes = [8, 32], strides = [1, 1]} : vector<8x128xf32> to vector<8x32xf32>
    %27 = arith.negf %26 : vector<8x32xf32>
    %28 = math.exp %27 : vector<8x32xf32>
    %cst_11 = arith.constant 1.000000e+00 : f32
    %29 = vector.broadcast %cst_11 : f32 to vector<8x32xf32>
    %30 = arith.addf %29, %28 : vector<8x32xf32>
    %31 = arith.divf %29, %30 : vector<8x32xf32>
    %32 = arith.mulf %23, %4 : vector<8x32xf32>
    %33 = arith.mulf %17, %25 : vector<8x32xf32>
    %34 = arith.addf %32, %33 : vector<8x32xf32>
    %35 = math.tanh %34 : vector<8x32xf32>
    %36 = arith.mulf %31, %35 : vector<8x32xf32>
    %37 = arith.index_cast %c0_i32_4 : i32 to index
    %c0_12 = arith.constant 0 : index
    %c0_13 = arith.constant 0 : index
    %38 = vector.load %arg3[%37, %c0_12, %c0_13] : memref<8x8x32xf32, #tpu.memory_space<vmem>>, vector<1x8x32xf32>
    %39 = vector.shape_cast %38 : vector<1x8x32xf32> to vector<8x32xf32>
    %40 = vector.shape_cast %36 : vector<8x32xf32> to vector<1x8x32xf32>
    tpu.vector_store %arg3[%37, %c0_12, %c0_13], %40 {strides = array<i32>} : memref<8x8x32xf32, #tpu.memory_space<vmem>>, vector<1x8x32xf32>,
    %c1_i32 = arith.constant 1 : i32
    %41 = arith.index_cast %c1_i32 : i32 to index
    %c0_14 = arith.constant 0 : index
    %c0_15 = arith.constant 0 : index
    %42 = vector.load %arg1[%41, %c0_14, %c0_15] : memref<8x8x128xf32, #tpu.memory_space<vmem>>, vector<1x8x128xf32>
    %43 = vector.shape_cast %42 : vector<1x8x128xf32> to vector<8x128xf32>
    %44 = arith.truncf %36 : vector<8x32xf32> to vector<8x32xbf16>
    %c0_16 = arith.constant 0 : index
    %c0_17 = arith.constant 0 : index
    %45 = vector.load %arg2[%c0_16, %c0_17] : memref<32x128xbf16, #tpu.memory_space<vmem>>, vector<32x128xbf16>
    %cst_18 = arith.constant dense<0.000000e+00> : vector<8x128xf32>
    %46 = tpu.matmul %44, %45, %cst_18 {dimension_numbers = #tpu.dot_dimension_numbers<[1], [0], [0], [1], [0, 0, 1, 1], [], []>} : vector<8x32xbf16>, vector<32x128xbf16>, vector<8x128xf32> -> vector<8x128xf32>
    %47 = arith.addf %43, %46 : vector<8x128xf32>
    %48 = vector.extract_strided_slice %47 {offsets = [0, 0], sizes = [8, 32], strides = [1, 1]} : vector<8x128xf32> to vector<8x32xf32>
    %49 = arith.negf %48 : vector<8x32xf32>
    %50 = math.exp %49 : vector<8x32xf32>
    %cst_19 = arith.constant 1.000000e+00 : f32
    %51 = vector.broadcast %cst_19 : f32 to vector<8x32xf32>
    %52 = arith.addf %51, %50 : vector<8x32xf32>
    %53 = arith.divf %51, %52 : vector<8x32xf32>
    %54 = vector.extract_strided_slice %47 {offsets = [0, 32], sizes = [8, 32], strides = [1, 1]} : vector<8x128xf32> to vector<8x32xf32>
    %55 = arith.negf %54 : vector<8x32xf32>
    %56 = math.exp %55 : vector<8x32xf32>
    %cst_20 = arith.constant 1.000000e+00 : f32
    %57 = vector.broadcast %cst_20 : f32 to vector<8x32xf32>
    %58 = arith.addf %57, %56 : vector<8x32xf32>
    %59 = arith.divf %57, %58 : vector<8x32xf32>
    %60 = vector.extract_strided_slice %47 {offsets = [0, 64], sizes = [8, 32], strides = [1, 1]} : vector<8x128xf32> to vector<8x32xf32>
    %61 = math.tanh %60 : vector<8x32xf32>
    %62 = vector.extract_strided_slice %47 {offsets = [0, 96], sizes = [8, 32], strides = [1, 1]} : vector<8x128xf32> to vector<8x32xf32>
    %63 = arith.negf %62 : vector<8x32xf32>
    %64 = math.exp %63 : vector<8x32xf32>
    %cst_21 = arith.constant 1.000000e+00 : f32
    %65 = vector.broadcast %cst_21 : f32 to vector<8x32xf32>
    %66 = arith.addf %65, %64 : vector<8x32xf32>
    %67 = arith.divf %65, %66 : vector<8x32xf32>
    %68 = arith.mulf %59, %34 : vector<8x32xf32>
    %69 = arith.mulf %53, %61 : vector<8x32xf32>
    %70 = arith.addf %68, %69 : vector<8x32xf32>
    %71 = math.tanh %70 : vector<8x32xf32>
    %72 = arith.mulf %67, %71 : vector<8x32xf32>
    %73 = arith.index_cast %c1_i32 : i32 to index
    %c0_22 = arith.constant 0 : index
    %c0_23 = arith.constant 0 : index
    %74 = vector.load %arg3[%73, %c0_22, %c0_23] : memref<8x8x32xf32, #tpu.memory_space<vmem>>, vector<1x8x32xf32>
    %75 = vector.shape_cast %74 : vector<1x8x32xf32> to vector<8x32xf32>
    %76 = vector.shape_cast %72 : vector<8x32xf32> to vector<1x8x32xf32>
    tpu.vector_store %arg3[%73, %c0_22, %c0_23], %76 {strides = array<i32>} : memref<8x8x32xf32, #tpu.memory_space<vmem>>, vector<1x8x32xf32>,
    %c2_i32 = arith.constant 2 : i32
    %77 = arith.index_cast %c2_i32 : i32 to index
    %c0_24 = arith.constant 0 : index
    %c0_25 = arith.constant 0 : index
    %78 = vector.load %arg1[%77, %c0_24, %c0_25] : memref<8x8x128xf32, #tpu.memory_space<vmem>>, vector<1x8x128xf32>
    %79 = vector.shape_cast %78 : vector<1x8x128xf32> to vector<8x128xf32>
    %80 = arith.truncf %72 : vector<8x32xf32> to vector<8x32xbf16>
    %c0_26 = arith.constant 0 : index
    %c0_27 = arith.constant 0 : index
    %81 = vector.load %arg2[%c0_26, %c0_27] : memref<32x128xbf16, #tpu.memory_space<vmem>>, vector<32x128xbf16>
    %cst_28 = arith.constant dense<0.000000e+00> : vector<8x128xf32>
    %82 = tpu.matmul %80, %81, %cst_28 {dimension_numbers = #tpu.dot_dimension_numbers<[1], [0], [0], [1], [0, 0, 1, 1], [], []>} : vector<8x32xbf16>, vector<32x128xbf16>, vector<8x128xf32> -> vector<8x128xf32>
    %83 = arith.addf %79, %82 : vector<8x128xf32>
    %84 = vector.extract_strided_slice %83 {offsets = [0, 0], sizes = [8, 32], strides = [1, 1]} : vector<8x128xf32> to vector<8x32xf32>
    %85 = arith.negf %84 : vector<8x32xf32>
    %86 = math.exp %85 : vector<8x32xf32>
    %cst_29 = arith.constant 1.000000e+00 : f32
    %87 = vector.broadcast %cst_29 : f32 to vector<8x32xf32>
    %88 = arith.addf %87, %86 : vector<8x32xf32>
    %89 = arith.divf %87, %88 : vector<8x32xf32>
    %90 = vector.extract_strided_slice %83 {offsets = [0, 32], sizes = [8, 32], strides = [1, 1]} : vector<8x128xf32> to vector<8x32xf32>
    %91 = arith.negf %90 : vector<8x32xf32>
    %92 = math.exp %91 : vector<8x32xf32>
    %cst_30 = arith.constant 1.000000e+00 : f32
    %93 = vector.broadcast %cst_30 : f32 to vector<8x32xf32>
    %94 = arith.addf %93, %92 : vector<8x32xf32>
    %95 = arith.divf %93, %94 : vector<8x32xf32>
    %96 = vector.extract_strided_slice %83 {offsets = [0, 64], sizes = [8, 32], strides = [1, 1]} : vector<8x128xf32> to vector<8x32xf32>
    %97 = math.tanh %96 : vector<8x32xf32>
    %98 = vector.extract_strided_slice %83 {offsets = [0, 96], sizes = [8, 32], strides = [1, 1]} : vector<8x128xf32> to vector<8x32xf32>
    %99 = arith.negf %98 : vector<8x32xf32>
    %100 = math.exp %99 : vector<8x32xf32>
    %cst_31 = arith.constant 1.000000e+00 : f32
    %101 = vector.broadcast %cst_31 : f32 to vector<8x32xf32>
    %102 = arith.addf %101, %100 : vector<8x32xf32>
    %103 = arith.divf %101, %102 : vector<8x32xf32>
    %104 = arith.mulf %95, %70 : vector<8x32xf32>
    %105 = arith.mulf %89, %97 : vector<8x32xf32>
    %106 = arith.addf %104, %105 : vector<8x32xf32>
    %107 = math.tanh %106 : vector<8x32xf32>
    %108 = arith.mulf %103, %107 : vector<8x32xf32>
    %109 = arith.index_cast %c2_i32 : i32 to index
    %c0_32 = arith.constant 0 : index
    %c0_33 = arith.constant 0 : index
    %110 = vector.load %arg3[%109, %c0_32, %c0_33] : memref<8x8x32xf32, #tpu.memory_space<vmem>>, vector<1x8x32xf32>
    %111 = vector.shape_cast %110 : vector<1x8x32xf32> to vector<8x32xf32>
    %112 = vector.shape_cast %108 : vector<8x32xf32> to vector<1x8x32xf32>
    tpu.vector_store %arg3[%109, %c0_32, %c0_33], %112 {strides = array<i32>} : memref<8x8x32xf32, #tpu.memory_space<vmem>>, vector<1x8x32xf32>,
    %c3_i32 = arith.constant 3 : i32
    %113 = arith.index_cast %c3_i32 : i32 to index
    %c0_34 = arith.constant 0 : index
    %c0_35 = arith.constant 0 : index
    %114 = vector.load %arg1[%113, %c0_34, %c0_35] : memref<8x8x128xf32, #tpu.memory_space<vmem>>, vector<1x8x128xf32>
    %115 = vector.shape_cast %114 : vector<1x8x128xf32> to vector<8x128xf32>
    %116 = arith.truncf %108 : vector<8x32xf32> to vector<8x32xbf16>
    %c0_36 = arith.constant 0 : index
    %c0_37 = arith.constant 0 : index
    %117 = vector.load %arg2[%c0_36, %c0_37] : memref<32x128xbf16, #tpu.memory_space<vmem>>, vector<32x128xbf16>
    %cst_38 = arith.constant dense<0.000000e+00> : vector<8x128xf32>
    %118 = tpu.matmul %116, %117, %cst_38 {dimension_numbers = #tpu.dot_dimension_numbers<[1], [0], [0], [1], [0, 0, 1, 1], [], []>} : vector<8x32xbf16>, vector<32x128xbf16>, vector<8x128xf32> -> vector<8x128xf32>
    %119 = arith.addf %115, %118 : vector<8x128xf32>
    %120 = vector.extract_strided_slice %119 {offsets = [0, 0], sizes = [8, 32], strides = [1, 1]} : vector<8x128xf32> to vector<8x32xf32>
    %121 = arith.negf %120 : vector<8x32xf32>
    %122 = math.exp %121 : vector<8x32xf32>
    %cst_39 = arith.constant 1.000000e+00 : f32
    %123 = vector.broadcast %cst_39 : f32 to vector<8x32xf32>
    %124 = arith.addf %123, %122 : vector<8x32xf32>
    %125 = arith.divf %123, %124 : vector<8x32xf32>
    %126 = vector.extract_strided_slice %119 {offsets = [0, 32], sizes = [8, 32], strides = [1, 1]} : vector<8x128xf32> to vector<8x32xf32>
    %127 = arith.negf %126 : vector<8x32xf32>
    %128 = math.exp %127 : vector<8x32xf32>
    %cst_40 = arith.constant 1.000000e+00 : f32
    %129 = vector.broadcast %cst_40 : f32 to vector<8x32xf32>
    %130 = arith.addf %129, %128 : vector<8x32xf32>
    %131 = arith.divf %129, %130 : vector<8x32xf32>
    %132 = vector.extract_strided_slice %119 {offsets = [0, 64], sizes = [8, 32], strides = [1, 1]} : vector<8x128xf32> to vector<8x32xf32>
    %133 = math.tanh %132 : vector<8x32xf32>
    %134 = vector.extract_strided_slice %119 {offsets = [0, 96], sizes = [8, 32], strides = [1, 1]} : vector<8x128xf32> to vector<8x32xf32>
    %135 = arith.negf %134 : vector<8x32xf32>
    %136 = math.exp %135 : vector<8x32xf32>
    %cst_41 = arith.constant 1.000000e+00 : f32
    %137 = vector.broadcast %cst_41 : f32 to vector<8x32xf32>
    %138 = arith.addf %137, %136 : vector<8x32xf32>
    %139 = arith.divf %137, %138 : vector<8x32xf32>
    %140 = arith.mulf %131, %106 : vector<8x32xf32>
    %141 = arith.mulf %125, %133 : vector<8x32xf32>
    %142 = arith.addf %140, %141 : vector<8x32xf32>
    %143 = math.tanh %142 : vector<8x32xf32>
    %144 = arith.mulf %139, %143 : vector<8x32xf32>
    %145 = arith.index_cast %c3_i32 : i32 to index
    %c0_42 = arith.constant 0 : index
    %c0_43 = arith.constant 0 : index
    %146 = vector.load %arg3[%145, %c0_42, %c0_43] : memref<8x8x32xf32, #tpu.memory_space<vmem>>, vector<1x8x32xf32>
    %147 = vector.shape_cast %146 : vector<1x8x32xf32> to vector<8x32xf32>
    %148 = vector.shape_cast %144 : vector<8x32xf32> to vector<1x8x32xf32>
    tpu.vector_store %arg3[%145, %c0_42, %c0_43], %148 {strides = array<i32>} : memref<8x8x32xf32, #tpu.memory_space<vmem>>, vector<1x8x32xf32>,
    %c4_i32 = arith.constant 4 : i32
    %149 = arith.index_cast %c4_i32 : i32 to index
    %c0_44 = arith.constant 0 : index
    %c0_45 = arith.constant 0 : index
    %150 = vector.load %arg1[%149, %c0_44, %c0_45] : memref<8x8x128xf32, #tpu.memory_space<vmem>>, vector<1x8x128xf32>
    %151 = vector.shape_cast %150 : vector<1x8x128xf32> to vector<8x128xf32>
    %152 = arith.truncf %144 : vector<8x32xf32> to vector<8x32xbf16>
    %c0_46 = arith.constant 0 : index
    %c0_47 = arith.constant 0 : index
    %153 = vector.load %arg2[%c0_46, %c0_47] : memref<32x128xbf16, #tpu.memory_space<vmem>>, vector<32x128xbf16>
    %cst_48 = arith.constant dense<0.000000e+00> : vector<8x128xf32>
    %154 = tpu.matmul %152, %153, %cst_48 {dimension_numbers = #tpu.dot_dimension_numbers<[1], [0], [0], [1], [0, 0, 1, 1], [], []>} : vector<8x32xbf16>, vector<32x128xbf16>, vector<8x128xf32> -> vector<8x128xf32>
    %155 = arith.addf %151, %154 : vector<8x128xf32>
    %156 = vector.extract_strided_slice %155 {offsets = [0, 0], sizes = [8, 32], strides = [1, 1]} : vector<8x128xf32> to vector<8x32xf32>
    %157 = arith.negf %156 : vector<8x32xf32>
    %158 = math.exp %157 : vector<8x32xf32>
    %cst_49 = arith.constant 1.000000e+00 : f32
    %159 = vector.broadcast %cst_49 : f32 to vector<8x32xf32>
    %160 = arith.addf %159, %158 : vector<8x32xf32>
    %161 = arith.divf %159, %160 : vector<8x32xf32>
    %162 = vector.extract_strided_slice %155 {offsets = [0, 32], sizes = [8, 32], strides = [1, 1]} : vector<8x128xf32> to vector<8x32xf32>
    %163 = arith.negf %162 : vector<8x32xf32>
    %164 = math.exp %163 : vector<8x32xf32>
    %cst_50 = arith.constant 1.000000e+00 : f32
    %165 = vector.broadcast %cst_50 : f32 to vector<8x32xf32>
    %166 = arith.addf %165, %164 : vector<8x32xf32>
    %167 = arith.divf %165, %166 : vector<8x32xf32>
    %168 = vector.extract_strided_slice %155 {offsets = [0, 64], sizes = [8, 32], strides = [1, 1]} : vector<8x128xf32> to vector<8x32xf32>
    %169 = math.tanh %168 : vector<8x32xf32>
    %170 = vector.extract_strided_slice %155 {offsets = [0, 96], sizes = [8, 32], strides = [1, 1]} : vector<8x128xf32> to vector<8x32xf32>
    %171 = arith.negf %170 : vector<8x32xf32>
    %172 = math.exp %171 : vector<8x32xf32>
    %cst_51 = arith.constant 1.000000e+00 : f32
    %173 = vector.broadcast %cst_51 : f32 to vector<8x32xf32>
    %174 = arith.addf %173, %172 : vector<8x32xf32>
    %175 = arith.divf %173, %174 : vector<8x32xf32>
    %176 = arith.mulf %167, %142 : vector<8x32xf32>
    %177 = arith.mulf %161, %169 : vector<8x32xf32>
    %178 = arith.addf %176, %177 : vector<8x32xf32>
    %179 = math.tanh %178 : vector<8x32xf32>
    %180 = arith.mulf %175, %179 : vector<8x32xf32>
    %181 = arith.index_cast %c4_i32 : i32 to index
    %c0_52 = arith.constant 0 : index
    %c0_53 = arith.constant 0 : index
    %182 = vector.load %arg3[%181, %c0_52, %c0_53] : memref<8x8x32xf32, #tpu.memory_space<vmem>>, vector<1x8x32xf32>
    %183 = vector.shape_cast %182 : vector<1x8x32xf32> to vector<8x32xf32>
    %184 = vector.shape_cast %180 : vector<8x32xf32> to vector<1x8x32xf32>
    tpu.vector_store %arg3[%181, %c0_52, %c0_53], %184 {strides = array<i32>} : memref<8x8x32xf32, #tpu.memory_space<vmem>>, vector<1x8x32xf32>,
    %c5_i32 = arith.constant 5 : i32
    %185 = arith.index_cast %c5_i32 : i32 to index
    %c0_54 = arith.constant 0 : index
    %c0_55 = arith.constant 0 : index
    %186 = vector.load %arg1[%185, %c0_54, %c0_55] : memref<8x8x128xf32, #tpu.memory_space<vmem>>, vector<1x8x128xf32>
    %187 = vector.shape_cast %186 : vector<1x8x128xf32> to vector<8x128xf32>
    %188 = arith.truncf %180 : vector<8x32xf32> to vector<8x32xbf16>
    %c0_56 = arith.constant 0 : index
    %c0_57 = arith.constant 0 : index
    %189 = vector.load %arg2[%c0_56, %c0_57] : memref<32x128xbf16, #tpu.memory_space<vmem>>, vector<32x128xbf16>
    %cst_58 = arith.constant dense<0.000000e+00> : vector<8x128xf32>
    %190 = tpu.matmul %188, %189, %cst_58 {dimension_numbers = #tpu.dot_dimension_numbers<[1], [0], [0], [1], [0, 0, 1, 1], [], []>} : vector<8x32xbf16>, vector<32x128xbf16>, vector<8x128xf32> -> vector<8x128xf32>
    %191 = arith.addf %187, %190 : vector<8x128xf32>
    %192 = vector.extract_strided_slice %191 {offsets = [0, 0], sizes = [8, 32], strides = [1, 1]} : vector<8x128xf32> to vector<8x32xf32>
    %193 = arith.negf %192 : vector<8x32xf32>
    %194 = math.exp %193 : vector<8x32xf32>
    %cst_59 = arith.constant 1.000000e+00 : f32
    %195 = vector.broadcast %cst_59 : f32 to vector<8x32xf32>
    %196 = arith.addf %195, %194 : vector<8x32xf32>
    %197 = arith.divf %195, %196 : vector<8x32xf32>
    %198 = vector.extract_strided_slice %191 {offsets = [0, 32], sizes = [8, 32], strides = [1, 1]} : vector<8x128xf32> to vector<8x32xf32>
    %199 = arith.negf %198 : vector<8x32xf32>
    %200 = math.exp %199 : vector<8x32xf32>
    %cst_60 = arith.constant 1.000000e+00 : f32
    %201 = vector.broadcast %cst_60 : f32 to vector<8x32xf32>
    %202 = arith.addf %201, %200 : vector<8x32xf32>
    %203 = arith.divf %201, %202 : vector<8x32xf32>
    %204 = vector.extract_strided_slice %191 {offsets = [0, 64], sizes = [8, 32], strides = [1, 1]} : vector<8x128xf32> to vector<8x32xf32>
    %205 = math.tanh %204 : vector<8x32xf32>
    %206 = vector.extract_strided_slice %191 {offsets = [0, 96], sizes = [8, 32], strides = [1, 1]} : vector<8x128xf32> to vector<8x32xf32>
    %207 = arith.negf %206 : vector<8x32xf32>
    %208 = math.exp %207 : vector<8x32xf32>
    %cst_61 = arith.constant 1.000000e+00 : f32
    %209 = vector.broadcast %cst_61 : f32 to vector<8x32xf32>
    %210 = arith.addf %209, %208 : vector<8x32xf32>
    %211 = arith.divf %209, %210 : vector<8x32xf32>
    %212 = arith.mulf %203, %178 : vector<8x32xf32>
    %213 = arith.mulf %197, %205 : vector<8x32xf32>
    %214 = arith.addf %212, %213 : vector<8x32xf32>
    %215 = math.tanh %214 : vector<8x32xf32>
    %216 = arith.mulf %211, %215 : vector<8x32xf32>
    %217 = arith.index_cast %c5_i32 : i32 to index
    %c0_62 = arith.constant 0 : index
    %c0_63 = arith.constant 0 : index
    %218 = vector.load %arg3[%217, %c0_62, %c0_63] : memref<8x8x32xf32, #tpu.memory_space<vmem>>, vector<1x8x32xf32>
    %219 = vector.shape_cast %218 : vector<1x8x32xf32> to vector<8x32xf32>
    %220 = vector.shape_cast %216 : vector<8x32xf32> to vector<1x8x32xf32>
    tpu.vector_store %arg3[%217, %c0_62, %c0_63], %220 {strides = array<i32>} : memref<8x8x32xf32, #tpu.memory_space<vmem>>, vector<1x8x32xf32>,
    %c6_i32 = arith.constant 6 : i32
    %221 = arith.index_cast %c6_i32 : i32 to index
    %c0_64 = arith.constant 0 : index
    %c0_65 = arith.constant 0 : index
    %222 = vector.load %arg1[%221, %c0_64, %c0_65] : memref<8x8x128xf32, #tpu.memory_space<vmem>>, vector<1x8x128xf32>
    %223 = vector.shape_cast %222 : vector<1x8x128xf32> to vector<8x128xf32>
    %224 = arith.truncf %216 : vector<8x32xf32> to vector<8x32xbf16>
    %c0_66 = arith.constant 0 : index
    %c0_67 = arith.constant 0 : index
    %225 = vector.load %arg2[%c0_66, %c0_67] : memref<32x128xbf16, #tpu.memory_space<vmem>>, vector<32x128xbf16>
    %cst_68 = arith.constant dense<0.000000e+00> : vector<8x128xf32>
    %226 = tpu.matmul %224, %225, %cst_68 {dimension_numbers = #tpu.dot_dimension_numbers<[1], [0], [0], [1], [0, 0, 1, 1], [], []>} : vector<8x32xbf16>, vector<32x128xbf16>, vector<8x128xf32> -> vector<8x128xf32>
    %227 = arith.addf %223, %226 : vector<8x128xf32>
    %228 = vector.extract_strided_slice %227 {offsets = [0, 0], sizes = [8, 32], strides = [1, 1]} : vector<8x128xf32> to vector<8x32xf32>
    %229 = arith.negf %228 : vector<8x32xf32>
    %230 = math.exp %229 : vector<8x32xf32>
    %cst_69 = arith.constant 1.000000e+00 : f32
    %231 = vector.broadcast %cst_69 : f32 to vector<8x32xf32>
    %232 = arith.addf %231, %230 : vector<8x32xf32>
    %233 = arith.divf %231, %232 : vector<8x32xf32>
    %234 = vector.extract_strided_slice %227 {offsets = [0, 32], sizes = [8, 32], strides = [1, 1]} : vector<8x128xf32> to vector<8x32xf32>
    %235 = arith.negf %234 : vector<8x32xf32>
    %236 = math.exp %235 : vector<8x32xf32>
    %cst_70 = arith.constant 1.000000e+00 : f32
    %237 = vector.broadcast %cst_70 : f32 to vector<8x32xf32>
    %238 = arith.addf %237, %236 : vector<8x32xf32>
    %239 = arith.divf %237, %238 : vector<8x32xf32>
    %240 = vector.extract_strided_slice %227 {offsets = [0, 64], sizes = [8, 32], strides = [1, 1]} : vector<8x128xf32> to vector<8x32xf32>
    %241 = math.tanh %240 : vector<8x32xf32>
    %242 = vector.extract_strided_slice %227 {offsets = [0, 96], sizes = [8, 32], strides = [1, 1]} : vector<8x128xf32> to vector<8x32xf32>
    %243 = arith.negf %242 : vector<8x32xf32>
    %244 = math.exp %243 : vector<8x32xf32>
    %cst_71 = arith.constant 1.000000e+00 : f32
    %245 = vector.broadcast %cst_71 : f32 to vector<8x32xf32>
    %246 = arith.addf %245, %244 : vector<8x32xf32>
    %247 = arith.divf %245, %246 : vector<8x32xf32>
    %248 = arith.mulf %239, %214 : vector<8x32xf32>
    %249 = arith.mulf %233, %241 : vector<8x32xf32>
    %250 = arith.addf %248, %249 : vector<8x32xf32>
    %251 = math.tanh %250 : vector<8x32xf32>
    %252 = arith.mulf %247, %251 : vector<8x32xf32>
    %253 = arith.index_cast %c6_i32 : i32 to index
    %c0_72 = arith.constant 0 : index
    %c0_73 = arith.constant 0 : index
    %254 = vector.load %arg3[%253, %c0_72, %c0_73] : memref<8x8x32xf32, #tpu.memory_space<vmem>>, vector<1x8x32xf32>
    %255 = vector.shape_cast %254 : vector<1x8x32xf32> to vector<8x32xf32>
    %256 = vector.shape_cast %252 : vector<8x32xf32> to vector<1x8x32xf32>
    tpu.vector_store %arg3[%253, %c0_72, %c0_73], %256 {strides = array<i32>} : memref<8x8x32xf32, #tpu.memory_space<vmem>>, vector<1x8x32xf32>,
    %c7_i32 = arith.constant 7 : i32
    %257 = arith.index_cast %c7_i32 : i32 to index
    %c0_74 = arith.constant 0 : index
    %c0_75 = arith.constant 0 : index
    %258 = vector.load %arg1[%257, %c0_74, %c0_75] : memref<8x8x128xf32, #tpu.memory_space<vmem>>, vector<1x8x128xf32>
    %259 = vector.shape_cast %258 : vector<1x8x128xf32> to vector<8x128xf32>
    %260 = arith.truncf %252 : vector<8x32xf32> to vector<8x32xbf16>
    %c0_76 = arith.constant 0 : index
    %c0_77 = arith.constant 0 : index
    %261 = vector.load %arg2[%c0_76, %c0_77] : memref<32x128xbf16, #tpu.memory_space<vmem>>, vector<32x128xbf16>
    %cst_78 = arith.constant dense<0.000000e+00> : vector<8x128xf32>
    %262 = tpu.matmul %260, %261, %cst_78 {dimension_numbers = #tpu.dot_dimension_numbers<[1], [0], [0], [1], [0, 0, 1, 1], [], []>} : vector<8x32xbf16>, vector<32x128xbf16>, vector<8x128xf32> -> vector<8x128xf32>
    %263 = arith.addf %259, %262 : vector<8x128xf32>
    %264 = vector.extract_strided_slice %263 {offsets = [0, 0], sizes = [8, 32], strides = [1, 1]} : vector<8x128xf32> to vector<8x32xf32>
    %265 = arith.negf %264 : vector<8x32xf32>
    %266 = math.exp %265 : vector<8x32xf32>
    %cst_79 = arith.constant 1.000000e+00 : f32
    %267 = vector.broadcast %cst_79 : f32 to vector<8x32xf32>
    %268 = arith.addf %267, %266 : vector<8x32xf32>
    %269 = arith.divf %267, %268 : vector<8x32xf32>
    %270 = vector.extract_strided_slice %263 {offsets = [0, 32], sizes = [8, 32], strides = [1, 1]} : vector<8x128xf32> to vector<8x32xf32>
    %271 = arith.negf %270 : vector<8x32xf32>
    %272 = math.exp %271 : vector<8x32xf32>
    %cst_80 = arith.constant 1.000000e+00 : f32
    %273 = vector.broadcast %cst_80 : f32 to vector<8x32xf32>
    %274 = arith.addf %273, %272 : vector<8x32xf32>
    %275 = arith.divf %273, %274 : vector<8x32xf32>
    %276 = vector.extract_strided_slice %263 {offsets = [0, 64], sizes = [8, 32], strides = [1, 1]} : vector<8x128xf32> to vector<8x32xf32>
    %277 = math.tanh %276 : vector<8x32xf32>
    %278 = vector.extract_strided_slice %263 {offsets = [0, 96], sizes = [8, 32], strides = [1, 1]} : vector<8x128xf32> to vector<8x32xf32>
    %279 = arith.negf %278 : vector<8x32xf32>
    %280 = math.exp %279 : vector<8x32xf32>
    %cst_81 = arith.constant 1.000000e+00 : f32
    %281 = vector.broadcast %cst_81 : f32 to vector<8x32xf32>
    %282 = arith.addf %281, %280 : vector<8x32xf32>
    %283 = arith.divf %281, %282 : vector<8x32xf32>
    %284 = arith.mulf %275, %250 : vector<8x32xf32>
    %285 = arith.mulf %269, %277 : vector<8x32xf32>
    %286 = arith.addf %284, %285 : vector<8x32xf32>
    %287 = math.tanh %286 : vector<8x32xf32>
    %288 = arith.mulf %283, %287 : vector<8x32xf32>
    %289 = arith.index_cast %c7_i32 : i32 to index
    %c0_82 = arith.constant 0 : index
    %c0_83 = arith.constant 0 : index
    %290 = vector.load %arg3[%289, %c0_82, %c0_83] : memref<8x8x32xf32, #tpu.memory_space<vmem>>, vector<1x8x32xf32>
    %291 = vector.shape_cast %290 : vector<1x8x32xf32> to vector<8x32xf32>
    %292 = vector.shape_cast %288 : vector<8x32xf32> to vector<1x8x32xf32>
    tpu.vector_store %arg3[%289, %c0_82, %c0_83], %292 {strides = array<i32>} : memref<8x8x32xf32, #tpu.memory_space<vmem>>, vector<1x8x32xf32>,
    %c8_i32 = arith.constant 8 : i32
    %c0_84 = arith.constant 0 : index
    %c0_85 = arith.constant 0 : index
    %293 = vector.load %arg6[%c0_84, %c0_85] : memref<8x32xf32, #tpu.memory_space<vmem>>, vector<8x32xf32>
    tpu.vector_store %arg6[%c0_84, %c0_85], %288 {strides = array<i32>} : memref<8x32xf32, #tpu.memory_space<vmem>>, vector<8x32xf32>,
    %c0_86 = arith.constant 0 : index
    %c0_87 = arith.constant 0 : index
    %294 = vector.load %arg7[%c0_86, %c0_87] : memref<8x32xf32, #tpu.memory_space<vmem>>, vector<8x32xf32>
    tpu.vector_store %arg7[%c0_86, %c0_87], %286 {strides = array<i32>} : memref<8x32xf32, #tpu.memory_space<vmem>>, vector<8x32xf32>,
    %c0_i32_88 = arith.constant 0 : i32
    %295 = arith.cmpi eq, %arg0, %c0_i32_88 : i32
    %296 = arith.extui %295 : i1 to i32
    %c0_i32_89 = arith.constant 0 : i32
    %297 = arith.cmpi ne, %296, %c0_i32_89 : i32
    scf.if %297 {
      %c0_90 = arith.constant 0 : index
      %c0_91 = arith.constant 0 : index
      %298 = vector.load %arg4[%c0_90, %c0_91] : memref<8x32xf32, #tpu.memory_space<vmem>>, vector<8x32xf32>
      tpu.vector_store %arg4[%c0_90, %c0_91], %288 {strides = array<i32>} : memref<8x32xf32, #tpu.memory_space<vmem>>, vector<8x32xf32>,
      %c0_92 = arith.constant 0 : index
      %c0_93 = arith.constant 0 : index
      %299 = vector.load %arg5[%c0_92, %c0_93] : memref<8x32xf32, #tpu.memory_space<vmem>>, vector<8x32xf32>
      tpu.vector_store %arg5[%c0_92, %c0_93], %286 {strides = array<i32>} : memref<8x32xf32, #tpu.memory_space<vmem>>, vector<8x32xf32>,
    } else {
    }
    return
  }
  func.func @transform_0(%arg0: i32) -> (i32, i32, i32) {
    %c0_i32 = arith.constant 0 : i32
    %c0_i32_0 = arith.constant 0 : i32
    %c0_i32_1 = arith.constant 0 : i32
    return %arg0, %c0_i32, %c0_i32_0 : i32, i32, i32
  }
  func.func @transform_1(%arg0: i32) -> (i32, i32) {
    %c0_i32 = arith.constant 0 : i32
    %c0_i32_0 = arith.constant 0 : i32
    %c0_i32_1 = arith.constant 0 : i32
    return %c0_i32, %c0_i32_0 : i32, i32
  }
  func.func @transform_2(%arg0: i32) -> (i32, i32, i32) {
    %c0_i32 = arith.constant 0 : i32
    %c0_i32_0 = arith.constant 0 : i32
    %c0_i32_1 = arith.constant 0 : i32
    return %arg0, %c0_i32, %c0_i32_0 : i32, i32, i32
  }
  func.func @transform_3(%arg0: i32) -> (i32, i32) {
    %c0_i32 = arith.constant 0 : i32
    %c0_i32_0 = arith.constant 0 : i32
    %c0_i32_1 = arith.constant 0 : i32
    return %c0_i32, %c0_i32_0 : i32, i32
  }
  func.func @transform_4(%arg0: i32) -> (i32, i32) {
    %c0_i32 = arith.constant 0 : i32
    %c0_i32_0 = arith.constant 0 : i32
    %c0_i32_1 = arith.constant 0 : i32
    return %c0_i32, %c0_i32_0 : i32, i32
  }
}

</mosaic_0001>

<bundles_post_ra>
// kernel: rnn_encoder_forward.2
= control target key start
LH: loop header
LB: loop body
LE: loop exit
PB: predicated region body
PF: predicated region fallthrough
CT: control target
= control target key end

     0   :  { %vm19_vm0 = vcmask 261120   ;;  %v1034_v0 = vmov 0.0   ;;  %vm1035_vm1 = vmmov 0   ;;  %s1036_s21 = smov 64   ;;  %s1037_s22 = smov 32   ;;  %s1292_s1 = inlined_call_operand.vmem [shape: bf16[32,128], index: 1, kind: input, shape index: {}]   ;;  %s1293_s0 = inlined_call_operand.vmem [shape: f32[8,8,128], index: 0, kind: input, shape index: {}]   ;;  %s1294_s2 = inlined_call_operand.vmem [shape: f32[8,8,32], index: 2, kind: output, shape index: {0}]   ;;  %s1295_s4 = inlined_call_operand.vmem [shape: f32[8,32], index: 4, kind: output, shape index: {2}]   ;;  %s1296_s3 = inlined_call_operand.vmem [shape: f32[8,32], index: 3, kind: output, shape index: {1}]  }
   0x1   :  { %885 = vmatprep.subr.bf16.mxu0 %v1034_v0  ;;  %v954_v1 = vld [vmem:[%s1292_s1 + $0x8] sm:$0xff]   ;;  %889 = vmatprep.mubr.msk.bf16.mxu0 %vm1035_vm1, %v1034_v0  ;;  %20 = vst.msk [vmem:[#allocation2] sm:$0xff] %vm19_vm0, %v1034_v0  ;;  %21 = vst.msk [vmem:[#allocation3] sm:$0xff] %vm19_vm0, %v1034_v0  ;;  %v955_v2 = vld [vmem:[%s1292_s1] sm:$0xff]  }
   0x2   :  { %893 = vmatprep.subr.bf16.mxu1 %v1034_v0  ;;  %897 = vmatprep.mubr.msk.bf16.mxu1 %vm1035_vm1, %v1034_v0  ;;  %v24_v5 = vld [vmem:[%s1293_s0] sm:$0xff]  ;;  %v956_v23 = vld [vmem:[%s1292_s1 + $0x8] sm:$0xff]   ;;  %v825_v53 = vld [vmem:[%s1293_s0 + $0x10] sm:$0xff] }
   0x3   :  { %886 = vmatpush3.bf16.msra.mxu0 %v954_v1  ;;  %894 = vmatpush3.bf16.msra.mxu1 %v956_v23  ;;  %v957_v24 = vld [vmem:[%s1292_s1] sm:$0xff]   ;;  %v819_v30 = vld [vmem:[%s1293_s0 + $0x8] sm:$0xff] }
   0x4   :  { %887 = vmatprep.subr.bf16.mxu0 %v1034_v0  ;;  %895 = vmatprep.subr.bf16.mxu1 %v1034_v0  ;;  %v958_v46 = vld [vmem:[%s1292_s1 + $0x8] sm:$0xff]   ;;  %v959_v47 = vld [vmem:[%s1292_s1] sm:$0xff]  }
   0x7   :  { %888 = vmatpush3.bf16.msra.mxu0 %v955_v2  ;;  %896 = vmatpush3.bf16.msra.mxu1 %v957_v24 }
   0x8   :  { %v22_v3 = vld [vmem:[#allocation2] sm:$0xff]  ;;  %901 = vmatprep.subr.bf16.mxu0 %v1034_v0  ;;  %v23_v12 = vld [vmem:[#allocation3] sm:$0xff]  ;;  %909 = vmatprep.subr.bf16.mxu1 %v1034_v0 }
   0x9   :  { %v25_v4 = vpack.c.bf16 %v22_v3, %v22_v3 }
   0xb   :  { %890 = vmatmul.mubr.msk.bf16.vlgmr.msra.gmra.mxu0 %vm19_vm0, %v25_v4 }
   0xc   :  { %905 = vmatprep.mubr.msk.bf16.mxu0 %vm1035_vm1, %v1034_v0  ;;  %902 = vmatpush3.bf16.msra.mxu0 %v958_v46 }
   0xd   :  { %903 = vmatprep.subr.bf16.mxu0 %v1034_v0 }
  0x10   :  { %904 = vmatpush3.bf16.msra.mxu0 %v959_v47 }
  0x11   :  { %917 = vmatprep.subr.bf16.mxu0 %v1034_v0 }
  0xcb   :  { %v80_v6 = vpop.f32.mrf.mxu0 }
  0xcc   :  { %v86_v7 = vadd.f32 %v80_v6, %v24_v5  ;;  %v960_v6 = vld [vmem:[%s1292_s1 + $0x8] sm:$0xff]  }
  0xcd   :  { %v891_v8 = vpop.f32.mrf.mxu0 }
  0xce   :  { %970 = vtanh.f32 %v86_v7  ;;  %v818_v13 = vmul.f32 -1.442695, %v86_v7  ;;  %v961_v7 = vld [vmem:[%s1292_s1] sm:$0xff]  }
  0xcf   :  { %v83_v9 = vpop.f32.mrf.mxu0 }
  0xd0   :  { %972 = vpow2.f32 %v818_v13  ;;  %v831_v13 = vld [vmem:[%s1293_s0 + $0x18] sm:$0xff] }
  0xd1   :  { %v892_v10 = vpop.f32.mrf.mxu0 }
  0xdb   :  { %v971_v11 = vpop.eup %970 }
  0xdc   :  { %100 = vrot.lane.b32.xlu0 %v971_v11, %s1036_s21 }
  0xdd   :  { %v973_v14 = vpop.eup %972 }
  0xde   :  { %v90_v15 = vadd.f32 1.0, %v973_v14 }
  0xe0   :  { %95 = vrot.lane.b32.xlu0 %v23_v12, %s1037_s22  ;;  %974 = vrcp.f32 %v90_v15 }
  0xed   :  { %v975_v16 = vpop.eup %974 }
 0x14e   :  { %v101_v17 = vpop.permute.xlu0 %100 }
 0x14f   :  { %v103_v18 = vmul.f32 %v975_v16, %v101_v17 }
 0x151   :  { %105 = vrot.lane.b32.xlu1 %v103_v18, %s1037_s22 }
 0x152   :  { %v96_v19 = vpop.permute.xlu0 %95 }
 0x153   :  { %v98_v20 = vmul.f32 %v975_v16, %v96_v19 }
 0x1c3   :  { %v106_v21 = vpop.permute.xlu1 %105 }
 0x1c4   :  { %v108_v22 = vadd.f32 %v106_v21, %v98_v20 }
 0x1c6   :  { %976 = vtanh.f32 %v108_v22 }
 0x1d3   :  { %v977_v25 = vpop.eup %976 }
 0x1d4   :  { %111 = vrot.lane.b32.xlu1 %v977_v25, %s1036_s21 }
 0x246   :  { %v112_v26 = vpop.permute.xlu1 %111 }
 0x247   :  { %v1100_v27 = vmul.f32 %v975_v16, %v112_v26 }
 0x249   :  { %v122_v28 = vpack.c.bf16 %v1100_v27, %v1100_v27 }
 0x24b   :  { %128 = vrot.lane.b32.xlu0 %v122_v28, %s1037_s22 }
 0x2bd   :  { %v129_v29 = vpop.permute.xlu0 %128 }
 0x2be   :  { %898 = vmatmul.mubr.msk.bf16.vlgmr.msra.gmra.mxu1 %vm19_vm0, %v129_v29 }
 0x2bf   :  { %913 = vmatprep.mubr.msk.bf16.mxu1 %vm1035_vm1, %v1034_v0  ;;  %910 = vmatpush3.bf16.msra.mxu1 %v960_v6 }
 0x2c0   :  { %911 = vmatprep.subr.bf16.mxu1 %v1034_v0 }
 0x2c3   :  { %912 = vmatpush3.bf16.msra.mxu1 %v961_v7 }
 0x2c4   :  { %925 = vmatprep.subr.bf16.mxu1 %v1034_v0 }
 0x37e   :  { %v179_v31 = vpop.f32.mrf.mxu1 }
 0x37f   :  { %v185_v32 = vadd.f32 %v819_v30, %v179_v31  ;;  %v962_v30 = vld [vmem:[%s1292_s1 + $0x8] sm:$0xff]   ;;  %v963_v31 = vld [vmem:[%s1292_s1] sm:$0xff]  }
 0x380   :  { %v899_v33 = vpop.f32.mrf.mxu1 }
 0x381   :  { %978 = vtanh.f32 %v185_v32  ;;  %v823_v37 = vmul.f32 -1.442695, %v185_v32 }
 0x382   :  { %v182_v34 = vpop.f32.mrf.mxu1 }
 0x383   :  { %980 = vpow2.f32 %v823_v37  ;;  %v837_v37 = vld [vmem:[%s1293_s0 + $0x20] sm:$0xff] }
 0x384   :  { %v900_v35 = vpop.f32.mrf.mxu1 }
 0x38e   :  { %v979_v36 = vpop.eup %978 }
 0x38f   :  { %195 = vrot.lane.b32.xlu1 %v979_v36, %s1036_s21 }
 0x390   :  { %v981_v38 = vpop.eup %980 }
 0x391   :  { %v189_v39 = vadd.f32 1.0, %v981_v38 }
 0x393   :  { %982 = vrcp.f32 %v189_v39 }
 0x3a0   :  { %v983_v40 = vpop.eup %982 }
 0x3a1   :  { %v193_v43 = vmul.f32 %v983_v40, %v108_v22 }
 0x401   :  { %v196_v41 = vpop.permute.xlu1 %195 }
 0x402   :  { %v198_v42 = vmul.f32 %v983_v40, %v196_v41 }
 0x404   :  { %200 = vrot.lane.b32.xlu0 %v198_v42, %s1037_s22 }
 0x476   :  { %v201_v44 = vpop.permute.xlu0 %200 }
 0x477   :  { %v203_v45 = vadd.f32 %v201_v44, %v193_v43 }
 0x479   :  { %984 = vtanh.f32 %v203_v45 }
 0x486   :  { %v985_v48 = vpop.eup %984 }
 0x487   :  { %206 = vrot.lane.b32.xlu1 %v985_v48, %s1036_s21 }
 0x4f9   :  { %v207_v49 = vpop.permute.xlu1 %206 }
 0x4fa   :  { %v1122_v50 = vmul.f32 %v983_v40, %v207_v49 }
 0x4fc   :  { %v218_v51 = vpack.c.bf16 %v1122_v50, %v1122_v50 }
 0x4fe   :  { %224 = vrot.lane.b32.xlu0 %v218_v51, %s1037_s22 }
 0x570   :  { %v225_v52 = vpop.permute.xlu0 %224 }
 0x571   :  { %906 = vmatmul.mubr.msk.bf16.vlgmr.msra.gmra.mxu0 %vm19_vm0, %v225_v52 }
 0x572   :  { %921 = vmatprep.mubr.msk.bf16.mxu0 %vm1035_vm1, %v1034_v0  ;;  %918 = vmatpush3.bf16.msra.mxu0 %v962_v30 }
 0x573   :  { %919 = vmatprep.subr.bf16.mxu0 %v1034_v0 }
 0x576   :  { %920 = vmatpush3.bf16.msra.mxu0 %v963_v31 }
 0x577   :  { %933 = vmatprep.subr.bf16.mxu0 %v1034_v0 }
 0x631   :  { %v275_v54 = vpop.f32.mrf.mxu0 }
 0x632   :  { %v281_v55 = vadd.f32 %v825_v53, %v275_v54  ;;  %v964_v54 = vld [vmem:[%s1292_s1 + $0x8] sm:$0xff]  }
 0x633   :  { %v907_v56 = vpop.f32.mrf.mxu0 }
 0x634   :  { %986 = vtanh.f32 %v281_v55  ;;  %v829_v60 = vmul.f32 -1.442695, %v281_v55  ;;  %v965_v55 = vld [vmem:[%s1292_s1] sm:$0xff]  }
 0x635   :  { %v278_v57 = vpop.f32.mrf.mxu0 }
 0x636   :  { %988 = vpow2.f32 %v829_v60 }
 0x637   :  { %v908_v58 = vpop.f32.mrf.mxu0 }
 0x641   :  { %v987_v59 = vpop.eup %986 }
 0x642   :  { %291 = vrot.lane.b32.xlu1 %v987_v59, %s1036_s21 }
 0x643   :  { %v989_v61 = vpop.eup %988 }
 0x644   :  { %v285_v62 = vadd.f32 1.0, %v989_v61  ;;  %v843_v61 = vld [vmem:[%s1293_s0 + $0x28] sm:$0xff] }
 0x646   :  { %990 = vrcp.f32 %v285_v62 }
 0x653   :  { %v991_v63 = vpop.eup %990 }
 0x654   :  { %v289_v3 = vmul.f32 %v991_v63, %v203_v45 }
 0x6b4   :  { %v292_v1 = vpop.permute.xlu1 %291 }
 0x6b5   :  { %v294_v2 = vmul.f32 %v991_v63, %v292_v1 }
 0x6b7   :  { %296 = vrot.lane.b32.xlu0 %v294_v2, %s1037_s22 }
 0x729   :  { %v297_v4 = vpop.permute.xlu0 %296 }
 0x72a   :  { %v299_v5 = vadd.f32 %v297_v4, %v289_v3 }
 0x72c   :  { %992 = vtanh.f32 %v299_v5 }
 0x739   :  { %v993_v8 = vpop.eup %992 }
 0x73a   :  { %302 = vrot.lane.b32.xlu1 %v993_v8, %s1036_s21 }
 0x7ac   :  { %v303_v9 = vpop.permute.xlu1 %302 }
 0x7ad   :  { %v1144_v10 = vmul.f32 %v991_v63, %v303_v9 }
 0x7af   :  { %v314_v11 = vpack.c.bf16 %v1144_v10, %v1144_v10 }
 0x7b1   :  { %320 = vrot.lane.b32.xlu0 %v314_v11, %s1037_s22 }
 0x823   :  { %v321_v12 = vpop.permute.xlu0 %320 }
 0x824   :  { %914 = vmatmul.mubr.msk.bf16.vlgmr.msra.gmra.mxu1 %vm19_vm0, %v321_v12 }
 0x825   :  { %929 = vmatprep.mubr.msk.bf16.mxu1 %vm1035_vm1, %v1034_v0  ;;  %926 = vmatpush3.bf16.msra.mxu1 %v964_v54 }
 0x826   :  { %927 = vmatprep.subr.bf16.mxu1 %v1034_v0 }
 0x829   :  { %928 = vmatpush3.bf16.msra.mxu1 %v965_v55 }
 0x82a   :  { %941 = vmatprep.subr.bf16.mxu1 %v1034_v0 }
 0x8e4   :  { %v371_v14 = vpop.f32.mrf.mxu1 }
 0x8e5   :  { %v377_v15 = vadd.f32 %v831_v13, %v371_v14 }
 0x8e6   :  { %v915_v16 = vpop.f32.mrf.mxu1 }
 0x8e7   :  { %994 = vtanh.f32 %v377_v15  ;;  %v835_v20 = vmul.f32 -1.442695, %v377_v15  ;;  %v966_v15 = vld [vmem:[%s1292_s1 + $0x8] sm:$0xff]   ;;  %v967_v16 = vld [vmem:[%s1292_s1] sm:$0xff]  }
 0x8e8   :  { %v374_v17 = vpop.f32.mrf.mxu1 }
 0x8e9   :  { %996 = vpow2.f32 %v835_v20 }
 0x8ea   :  { %v916_v18 = vpop.f32.mrf.mxu1 }
 0x8f4   :  { %v995_v19 = vpop.eup %994 }
 0x8f5   :  { %387 = vrot.lane.b32.xlu1 %v995_v19, %s1036_s21 }
 0x8f6   :  { %v997_v21 = vpop.eup %996 }
 0x8f7   :  { %v381_v22 = vadd.f32 1.0, %v997_v21 }
 0x8f9   :  { %998 = vrcp.f32 %v381_v22  ;;  %v849_v22 = vld [vmem:[%s1293_s0 + $0x30] sm:$0xff] }
 0x906   :  { %v999_v23 = vpop.eup %998 }
 0x907   :  { %v385_v26 = vmul.f32 %v999_v23, %v299_v5 }
 0x967   :  { %v388_v24 = vpop.permute.xlu1 %387 }
 0x968   :  { %v390_v25 = vmul.f32 %v999_v23, %v388_v24 }
 0x96a   :  { %392 = vrot.lane.b32.xlu0 %v390_v25, %s1037_s22 }
 0x9dc   :  { %v393_v28 = vpop.permute.xlu0 %392 }
 0x9dd   :  { %v395_v29 = vadd.f32 %v393_v28, %v385_v26 }
 0x9df   :  { %1000 = vtanh.f32 %v395_v29 }
 0x9ec   :  { %v1001_v32 = vpop.eup %1000 }
 0x9ed   :  { %398 = vrot.lane.b32.xlu1 %v1001_v32, %s1036_s21 }
 0xa5f   :  { %v399_v33 = vpop.permute.xlu1 %398 }
 0xa60   :  { %v1166_v34 = vmul.f32 %v999_v23, %v399_v33 }
 0xa62   :  { %v410_v35 = vpack.c.bf16 %v1166_v34, %v1166_v34 }
 0xa64   :  { %416 = vrot.lane.b32.xlu0 %v410_v35, %s1037_s22 }
 0xad6   :  { %v417_v36 = vpop.permute.xlu0 %416 }
 0xad7   :  { %922 = vmatmul.mubr.msk.bf16.vlgmr.msra.gmra.mxu0 %vm19_vm0, %v417_v36 }
 0xad8   :  { %937 = vmatprep.mubr.msk.bf16.mxu0 %vm1035_vm1, %v1034_v0  ;;  %934 = vmatpush3.bf16.msra.mxu0 %v966_v15 }
 0xad9   :  { %935 = vmatprep.subr.bf16.mxu0 %v1034_v0 }
 0xadc   :  { %936 = vmatpush3.bf16.msra.mxu0 %v967_v16 }
 0xb97   :  { %v467_v38 = vpop.f32.mrf.mxu0 }
 0xb98   :  { %v473_v39 = vadd.f32 %v837_v37, %v467_v38 }
 0xb99   :  { %v923_v40 = vpop.f32.mrf.mxu0 }
 0xb9a   :  { %1002 = vtanh.f32 %v473_v39  ;;  %v841_v44 = vmul.f32 -1.442695, %v473_v39  ;;  %v968_v40 = vld [vmem:[%s1292_s1 + $0x8] sm:$0xff]  }
 0xb9b   :  { %v470_v41 = vpop.f32.mrf.mxu0 }
 0xb9c   :  { %1004 = vpow2.f32 %v841_v44  ;;  %v969_v41 = vld [vmem:[%s1292_s1] sm:$0xff]  }
 0xb9d   :  { %v924_v42 = vpop.f32.mrf.mxu0 }
 0xba7   :  { %v1003_v43 = vpop.eup %1002 }
 0xba8   :  { %483 = vrot.lane.b32.xlu1 %v1003_v43, %s1036_s21 }
 0xba9   :  { %v1005_v45 = vpop.eup %1004 }
 0xbaa   :  { %v477_v46 = vadd.f32 1.0, %v1005_v45 }
 0xbac   :  { %1006 = vrcp.f32 %v477_v46 }
 0xbb9   :  { %v1007_v47 = vpop.eup %1006 }
 0xbba   :  { %v481_v51 = vmul.f32 %v1007_v47, %v395_v29 }
 0xc1a   :  { %v484_v48 = vpop.permute.xlu1 %483 }
 0xc1b   :  { %v486_v49 = vmul.f32 %v1007_v47, %v484_v48 }
 0xc1d   :  { %488 = vrot.lane.b32.xlu0 %v486_v49, %s1037_s22 }
 0xc8f   :  { %v489_v52 = vpop.permute.xlu0 %488 }
 0xc90   :  { %v491_v53 = vadd.f32 %v489_v52, %v481_v51 }
 0xc92   :  { %1008 = vtanh.f32 %v491_v53 }
 0xc9f   :  { %v1009_v56 = vpop.eup %1008 }
 0xca0   :  { %494 = vrot.lane.b32.xlu1 %v1009_v56, %s1036_s21 }
 0xd12   :  { %v495_v57 = vpop.permute.xlu1 %494 }
 0xd13   :  { %v1188_v58 = vmul.f32 %v1007_v47, %v495_v57  ;;  %v855_v47 = vld [vmem:[%s1293_s0 + $0x38] sm:$0xff]  ;;  %s1038_s0 = smov 96  }
 0xd15   :  { %v506_v59 = vpack.c.bf16 %v1188_v58, %v1188_v58 }
 0xd17   :  { %512 = vrot.lane.b32.xlu0 %v506_v59, %s1037_s22 }
 0xd89   :  { %v513_v60 = vpop.permute.xlu0 %512 }
 0xd8a   :  { %930 = vmatmul.mubr.msk.bf16.vlgmr.msra.gmra.mxu1 %vm19_vm0, %v513_v60 }
 0xd8b   :  { %945 = vmatprep.mubr.msk.bf16.mxu1 %vm1035_vm1, %v1034_v0  ;;  %942 = vmatpush3.bf16.msra.mxu1 %v968_v40 }
 0xd8c   :  { %943 = vmatprep.subr.bf16.mxu1 %v1034_v0 }
 0xd8f   :  { %944 = vmatpush3.bf16.msra.mxu1 %v969_v41 }
 0xe4a   :  { %v563_v62 = vpop.f32.mrf.mxu1 }
 0xe4b   :  { %v569_v63 = vadd.f32 %v843_v61, %v563_v62 }
 0xe4c   :  { %v931_v1 = vpop.f32.mrf.mxu1 }
 0xe4d   :  { %1010 = vtanh.f32 %v569_v63  ;;  %v847_v5 = vmul.f32 -1.442695, %v569_v63 }
 0xe4e   :  { %v566_v2 = vpop.f32.mrf.mxu1 }
 0xe4f   :  { %1012 = vpow2.f32 %v847_v5 }
 0xe50   :  { %v932_v3 = vpop.f32.mrf.mxu1 }
 0xe5a   :  { %v1011_v4 = vpop.eup %1010 }
 0xe5b   :  { %579 = vrot.lane.b32.xlu1 %v1011_v4, %s1036_s21 }
 0xe5c   :  { %v1013_v6 = vpop.eup %1012 }
 0xe5d   :  { %v573_v7 = vadd.f32 1.0, %v1013_v6 }
 0xe5f   :  { %1014 = vrcp.f32 %v573_v7 }
 0xe6c   :  { %v1015_v8 = vpop.eup %1014 }
 0xe6d   :  { %v577_v12 = vmul.f32 %v1015_v8, %v491_v53 }
 0xecd   :  { %v580_v9 = vpop.permute.xlu1 %579 }
 0xece   :  { %v582_v11 = vmul.f32 %v1015_v8, %v580_v9 }
 0xed0   :  { %584 = vrot.lane.b32.xlu0 %v582_v11, %s1037_s22 }
 0xf42   :  { %v585_v13 = vpop.permute.xlu0 %584 }
 0xf43   :  { %v587_v14 = vadd.f32 %v585_v13, %v577_v12 }
 0xf45   :  { %1016 = vtanh.f32 %v587_v14 }
 0xf52   :  { %v1017_v17 = vpop.eup %1016 }
 0xf53   :  { %590 = vrot.lane.b32.xlu1 %v1017_v17, %s1036_s21 }
 0xfc5   :  { %v591_v18 = vpop.permute.xlu1 %590 }
 0xfc6   :  { %v1209_v19 = vmul.f32 %v1015_v8, %v591_v18 }
 0xfc8   :  { %v602_v20 = vpack.c.bf16 %v1209_v19, %v1209_v19 }
 0xfca   :  { %608 = vrot.lane.b32.xlu0 %v602_v20, %s1037_s22 }
0x103c   :  { %v609_v21 = vpop.permute.xlu0 %608 }
0x103d   :  { %938 = vmatmul.mubr.msk.bf16.vlgmr.msra.gmra.mxu0 %vm19_vm0, %v609_v21 }
0x10fd   :  { %v659_v23 = vpop.f32.mrf.mxu0 }
0x10fe   :  { %v665_v24 = vadd.f32 %v849_v22, %v659_v23 }
0x10ff   :  { %v939_v25 = vpop.f32.mrf.mxu0 }
0x1100   :  { %1018 = vtanh.f32 %v665_v24  ;;  %v853_v30 = vmul.f32 -1.442695, %v665_v24 }
0x1101   :  { %v662_v26 = vpop.f32.mrf.mxu0 }
0x1102   :  { %1020 = vpow2.f32 %v853_v30 }
0x1103   :  { %v940_v28 = vpop.f32.mrf.mxu0 }
0x110d   :  { %v1019_v29 = vpop.eup %1018 }
0x110e   :  { %675 = vrot.lane.b32.xlu1 %v1019_v29, %s1036_s21 }
0x110f   :  { %v1021_v31 = vpop.eup %1020 }
0x1110   :  { %v669_v32 = vadd.f32 1.0, %v1021_v31 }
0x1112   :  { %1022 = vrcp.f32 %v669_v32 }
0x111f   :  { %v1023_v33 = vpop.eup %1022 }
0x1120   :  { %v673_v37 = vmul.f32 %v1023_v33, %v587_v14 }
0x1180   :  { %v676_v35 = vpop.permute.xlu1 %675 }
0x1181   :  { %v678_v36 = vmul.f32 %v1023_v33, %v676_v35 }
0x1183   :  { %680 = vrot.lane.b32.xlu0 %v678_v36, %s1037_s22 }
0x11f5   :  { %v681_v38 = vpop.permute.xlu0 %680 }
0x11f6   :  { %v683_v39 = vadd.f32 %v681_v38, %v673_v37 }
0x11f8   :  { %1024 = vtanh.f32 %v683_v39 }
0x1205   :  { %v1025_v42 = vpop.eup %1024 }
0x1206   :  { %686 = vrot.lane.b32.xlu1 %v1025_v42, %s1036_s21 }
0x1278   :  { %v687_v43 = vpop.permute.xlu1 %686 }
0x1279   :  { %v689_v44 = vmul.f32 %v1023_v33, %v687_v43 }
0x127b   :  { %v698_v45 = vpack.c.bf16 %v689_v44, %v689_v44 }
0x127d   :  { %704 = vrot.lane.b32.xlu0 %v698_v45, %s1037_s22 }
0x12ef   :  { %v705_v46 = vpop.permute.xlu0 %704 }
0x12f0   :  { %946 = vmatmul.mubr.msk.bf16.vlgmr.msra.gmra.mxu1 %vm19_vm0, %v705_v46 }
0x13b0   :  { %v755_v48 = vpop.f32.mrf.mxu1 }
0x13b1   :  { %v761_v49 = vadd.f32 %v855_v47, %v755_v48 }
0x13b2   :  { %v947_v51 = vpop.f32.mrf.mxu1 }
0x13b3   :  { %1026 = vtanh.f32 %v761_v49  ;;  %v859_v54 = vmul.f32 -1.442695, %v761_v49 }
0x13b4   :  { %v758_v0 = vpop.f32.mrf.mxu1 }
0x13b5   :  { %1028 = vpow2.f32 %v859_v54 }
0x13b6   :  { %v948_v52 = vpop.f32.mrf.mxu1 }
0x13c0   :  { %v1027_v53 = vpop.eup %1026 }
0x13c1   :  { %771 = vrot.lane.b32.xlu1 %v1027_v53, %s1036_s21 }
0x13c2   :  { %v1029_v55 = vpop.eup %1028 }
0x13c3   :  { %v765_v56 = vadd.f32 1.0, %v1029_v55 }
0x13c5   :  { %1030 = vrcp.f32 %v765_v56 }
0x13d2   :  { %v1031_v57 = vpop.eup %1030 }
0x13d3   :  { %v769_v61 = vmul.f32 %v1031_v57, %v683_v39 }
0x1433   :  { %v772_v59 = vpop.permute.xlu1 %771 }
0x1434   :  { %v774_v60 = vmul.f32 %v1031_v57, %v772_v59 }
0x1436   :  { %776 = vrot.lane.b32.xlu0 %v774_v60, %s1037_s22 }
0x143a   :  { %116 = vrot.lane.b32.xlu0 %v1100_v27, %s1037_s22 }
0x143e   :  { %307 = vrot.lane.b32.xlu0 %v1144_v10, %s1037_s22 }
0x1442   :  { %499 = vrot.lane.b32.xlu0 %v1188_v58, %s1037_s22 }
0x1446   :  { %691 = vrot.lane.b32.xlu0 %v689_v44, %s1037_s22 }
0x14a8   :  { %v777_v62 = vpop.permute.xlu0 %776 }
0x14a9   :  { %v779_v63 = vadd.f32 %v777_v62, %v769_v61 }
0x14ab   :  { %1032 = vtanh.f32 %v779_v63  ;;  %794 = vrot.lane.b32.xlu0 %v779_v63, %s1038_s0 }
0x14ac   :  { %v117_v1 = vpop.permute.xlu0 %116 }
0x14ad   :  { %119 = vst.msk [vmem:[%s1294_s2] sm:$0xff] %vm19_vm0, %v117_v1 }
0x14b0   :  { %v308_v27 = vpop.permute.xlu0 %307 }
0x14b1   :  { %830 = vst.msk [vmem:[%s1294_s2 + $0x10] sm:$0xff] %vm19_vm0, %v308_v27 }
0x14b4   :  { %v500_v10 = vpop.permute.xlu0 %499 }
0x14b5   :  { %842 = vst.msk [vmem:[%s1294_s2 + $0x20] sm:$0xff] %vm19_vm0, %v500_v10 }
0x14b8   :  { %v1033_v58 = vpop.eup %1032  ;;  %v692_v2 = vpop.permute.xlu0 %691 }
0x14b9   :  { %854 = vst.msk [vmem:[%s1294_s2 + $0x30] sm:$0xff] %vm19_vm0, %v692_v2  ;;  %782 = vrot.lane.b32.xlu1 %v1033_v58, %s1036_s21 }
0x14bd   :  { %211 = vrot.lane.b32.xlu1 %v1122_v50, %s1037_s22 }
0x14c1   :  { %403 = vrot.lane.b32.xlu1 %v1166_v34, %s1037_s22 }
0x14c5   :  { %595 = vrot.lane.b32.xlu1 %v1209_v19, %s1037_s22 }
0x151d   :  { %v795_v3 = vpop.permute.xlu0 %794 }
0x151e   :  { %797 = vst.msk [vmem:[#allocation3] sm:$0xff] %vm19_vm0, %v795_v3  ;;  %802 = vst.msk [vmem:[%s1295_s4] sm:$0xff] %vm19_vm0, %v795_v3 }
0x152b   :  { %v783_v4 = vpop.permute.xlu1 %782 }
0x152c   :  { %v785_v5 = vmul.f32 %v1031_v57, %v783_v4 }
0x152e   :  { %787 = vrot.lane.b32.xlu1 %v785_v5, %s1037_s22 }
0x152f   :  { %v212_v6 = vpop.permute.xlu1 %211 }
0x1530   :  { %824 = vst.msk [vmem:[%s1294_s2 + $0x8] sm:$0xff] %vm19_vm0, %v212_v6 }
0x1533   :  { %v404_v50 = vpop.permute.xlu1 %403 }
0x1534   :  { %836 = vst.msk [vmem:[%s1294_s2 + $0x18] sm:$0xff] %vm19_vm0, %v404_v50 }
0x1537   :  { %v596_v34 = vpop.permute.xlu1 %595 }
0x1538   :  { %848 = vst.msk [vmem:[%s1294_s2 + $0x28] sm:$0xff] %vm19_vm0, %v596_v34 }
0x15a0   :  { %v788_v7 = vpop.permute.xlu1 %787 }
0x15a1   :  { %860 = vst.msk [vmem:[%s1294_s2 + $0x38] sm:$0xff] %vm19_vm0, %v788_v7  ;;  %792 = vst.msk [vmem:[#allocation2] sm:$0xff] %vm19_vm0, %v788_v7 }
0x15a2   :  { %801 = vst.msk [vmem:[%s1296_s3] sm:$0xff] %vm19_vm0, %v788_v7 }

</bundles_post_ra>
